<compile_context>
chip_gen: v6e
topology: v6e:2x2x1
jax: 0.10.0
libtpu: 0.0.40
codegen_flags: <defaults>
</compile_context>

<pallas_src>
import functools

import jax
import jax.numpy as jnp
from jax.experimental import pallas as pl
from jax.experimental.pallas import tpu as pltpu


def _round_up(x, m):
    return ((x + m - 1) // m) * m


@functools.lru_cache(maxsize=1)
def _vmem_capacity_bytes():
    """Physical VMEM per TensorCore; conservative fallback = v7x's 64 MiB."""
    try:
        info = pltpu.get_tpu_info()
        cap = getattr(info, "vmem_capacity_bytes", None)
        if cap:
            return int(cap)
    except Exception:
        pass
    return 64 << 20


# --------------------------------- kernels ---------------------------------

def _resident_kernel(x_ref, w_ref, b_ref, o_ref):
    # x: (tile_b, D)   w: (D, C) resident across the whole batch grid
    # b: (1, C) f32    o: (tile_b, C)
    acc = jnp.dot(x_ref[...], w_ref[...], preferred_element_type=jnp.float32)
    o_ref[...] = (acc + b_ref[...]).astype(o_ref.dtype)


def _tiled_kernel(x_ref, w_ref, b_ref, o_ref, acc_ref):
    # x: (tile_b, tile_d)  w: (tile_d, tile_c)  b: (1, tile_c) f32
    # acc: (tile_b, tile_c) f32 scratch carried across the innermost D axis.
    k = pl.program_id(2)

    @pl.when(k == 0)
    def _():
        acc_ref[...] = jnp.zeros_like(acc_ref)

    acc_ref[...] += jnp.dot(x_ref[...], w_ref[...],
                            preferred_element_type=jnp.float32)

    @pl.when(k == pl.num_programs(2) - 1)
    def _():
        o_ref[...] = (acc_ref[...] + b_ref[...]).astype(o_ref.dtype)


# --------------------------------- wrapper ---------------------------------

@functools.partial(jax.jit,
                   static_argnames=("tile_b", "tile_c", "tile_d", "compute_dtype"))
def linear_classifier(samples, weight, bias, *, tile_b=None, tile_c=None,
                      tile_d=None, compute_dtype=None):
    """preds = samples @ weight.T + bias.

    samples: [B, D]; weight: [C, D] (torch nn.Linear layout); bias: [C].
    compute_dtype: optionally cast x / w (e.g. jnp.bfloat16) for MXU-native
    rate; accumulation stays f32 and the output keeps samples' original dtype.
    """
    B, D = samples.shape
    C, Dw = weight.shape
    assert D == Dw
    out_dtype = samples.dtype

    if compute_dtype is not None:
        samples = samples.astype(compute_dtype)
        weight = weight.astype(compute_dtype)
    in_dtype = samples.dtype
    itm_in = jnp.dtype(in_dtype).itemsize
    itm_out = jnp.dtype(out_dtype).itemsize
    sublane = max(8, 32 // itm_in)        # 8 for f32, 16 for bf16

    # ---- generation-aware VMEM budget (72% of physical, headroom for scratch) ----
    vmem_cap = _vmem_capacity_bytes()
    budget = int(vmem_cap * 0.72)
    vmem_hi = vmem_cap - (8 << 20)        # hard ceiling for scoped vmem

    # ---- padded problem dims (lane-dense output / aligned contraction) ----
    C_pad = _round_up(C, 128)
    D_pad = _round_up(D, 128)

    x, w, b = samples, weight, bias

    # ---------- path A: weight (+bias) fully VMEM-resident, 1-D batch grid ----------
    w_res_bytes = 2 * D_pad * C_pad * itm_in        # double-buffer accounting
    b_res_bytes = 2 * 8 * C_pad * 4
    per_row_bytes = 2 * (D_pad * itm_in + C_pad * itm_out)
    avail = budget - w_res_bytes - b_res_bytes

    want_resident = (tile_d is None and
                     (tile_c is None or _round_up(tile_c, 128) >= C_pad))
    resident_ok = False
    tb = 0
    if want_resident and avail > 0:
        if tile_b is None:
            tb = min(avail // per_row_bytes, 1024, _round_up(B, sublane))
            tb = (tb // sublane) * sublane
        else:
            tb = _round_up(tile_b, sublane)
        resident_ok = (tb >= sublane and
                       w_res_bytes + b_res_bytes + tb * per_row_bytes <= budget)

    if resident_ok:
        tile_b_ = int(tb)
        B_pad = _round_up(B, tile_b_)
        if (B_pad, D_pad) != (B, D):
            x = jnp.pad(x, ((0, B_pad - B), (0, D_pad - D)))
        if (C_pad, D_pad) != (C, D):
            w = jnp.pad(w, ((0, C_pad - C), (0, D_pad - D)))
        wT = w.T                                    # [D_pad, C_pad]: canonical MXU layout
        if C_pad != C:
            b = jnp.pad(b, ((0, C_pad - C),))
        b2 = b.reshape(1, C_pad).astype(jnp.float32)

        footprint = w_res_bytes + b_res_bytes + tile_b_ * per_row_bytes
        vmem_limit = int(max(min(footprint + (4 << 20), vmem_hi), 32 << 20))

        out = pl.pallas_call(
            _resident_kernel,
            out_shape=jax.ShapeDtypeStruct((B_pad, C_pad), out_dtype),
            grid_spec=pltpu.PrefetchScalarGridSpec(
                num_scalar_prefetch=0,
                grid=(B_pad // tile_b_,),
                in_specs=[
                    pl.BlockSpec((tile_b_, D_pad), lambda i: (i, 0)),
                    pl.BlockSpec((D_pad, C_pad), lambda i: (0, 0)),   # resident
                    pl.BlockSpec((1, C_pad), lambda i: (0, 0)),       # resident
                ],
                out_specs=pl.BlockSpec((tile_b_, C_pad), lambda i: (i, 0)),
            ),
            compiler_params=pltpu.CompilerParams(
                dimension_semantics=("parallel",),
                vmem_limit_bytes=vmem_limit,
            ),
        )(x, wT, b2)

    # ---------- path B: 3-D grid (batch, class, D) with f32 accumulator ----------
    else:
        if tile_c is None:
            tile_c_ = min(C_pad, 512)
        else:
            tile_c_ = min(_round_up(tile_c, 128), C_pad)
        if tile_b is None:
            tile_b_ = min(_round_up(B, sublane),
                          256 if vmem_cap <= (64 << 20) else 512)
        else:
            tile_b_ = _round_up(tile_b, sublane)
        tile_b_ = max(tile_b_, sublane)

        def _footprint(td):
            return (2 * tile_b_ * td * itm_in + 2 * td * tile_c_ * itm_in
                    + 2 * 8 * tile_c_ * 4 + 2 * tile_b_ * tile_c_ * itm_out
                    + tile_b_ * tile_c_ * 4)

        if tile_d is None:
            fixed = (2 * 8 * tile_c_ * 4 + 2 * tile_b_ * tile_c_ * itm_out
                     + tile_b_ * tile_c_ * 4)
            per_d = 2 * (tile_b_ + tile_c_) * itm_in
            td = (budget - fixed) // per_d if budget > fixed else 0
            td = max(128, (td // 128) * 128)
            tile_d_ = int(min(td, D_pad))
        else:
            tile_d_ = min(_round_up(tile_d, 128), D_pad)

        C_pad2 = _round_up(C_pad, tile_c_)
        D_pad2 = _round_up(D_pad, tile_d_)
        B_pad = _round_up(B, tile_b_)

        if (B_pad, D_pad2) != (B, D):
            x = jnp.pad(x, ((0, B_pad - B), (0, D_pad2 - D)))
        if (C_pad2, D_pad2) != (C, D):
            w = jnp.pad(w, ((0, C_pad2 - C), (0, D_pad2 - D)))
        wT = w.T                                    # [D_pad2, C_pad2]
        if C_pad2 != C:
            b = jnp.pad(b, ((0, C_pad2 - C),))
        b2 = b.reshape(1, C_pad2).astype(jnp.float32)

        vmem_limit = int(max(min(_footprint(tile_d_) + (4 << 20), vmem_hi), 32 << 20))

        # Re-stream the smaller operand: the larger of x / w takes the outer axis
        # (it is read once when D fits a single K tile).
        if B_pad >= C_pad2:
            grid = (B_pad // tile_b_, C_pad2 // tile_c_, D_pad2 // tile_d_)
            x_map = lambda i, j, k: (i, k)
            w_map = lambda i, j, k: (k, j)
            b_map = lambda i, j, k: (0, j)
            o_map = lambda i, j, k: (i, j)
        else:
            grid = (C_pad2 // tile_c_, B_pad // tile_b_, D_pad2 // tile_d_)
            x_map = lambda j, i, k: (i, k)
            w_map = lambda j, i, k: (k, j)
            b_map = lambda j, i, k: (0, j)
            o_map = lambda j, i, k: (i, j)

        out = pl.pallas_call(
            _tiled_kernel,
            out_shape=jax.ShapeDtypeStruct((B_pad, C_pad2), out_dtype),
            grid_spec=pltpu.PrefetchScalarGridSpec(
                num_scalar_prefetch=0,
                grid=grid,
                in_specs=[
                    pl.BlockSpec((tile_b_, tile_d_), x_map),
                    pl.BlockSpec((tile_d_, tile_c_), w_map),
                    pl.BlockSpec((1, tile_c_), b_map),
                ],
                out_specs=pl.BlockSpec((tile_b_, tile_c_), o_map),
                scratch_shapes=[pltpu.VMEM((tile_b_, tile_c_), jnp.float32)],
            ),
            compiler_params=pltpu.CompilerParams(
                dimension_semantics=("parallel", "parallel", "arbitrary"),
                vmem_limit_bytes=vmem_limit,
            ),
        )(x, wT, b2)

    if out.shape != (B, C):
        out = out[:B, :C]
    return out


def linear_postprocessor(samples, targets, weight, bias, **kw):
    """Mirrors LinearPostprocessor.forward(samples, targets)."""
    preds = linear_classifier(samples, weight, bias, **kw)
    return {"preds": preds, "target": targets}


if __name__ == "__main__":
    key = jax.random.PRNGKey(0)
    (k_x, k_w, k_b, k_t,
     k_x2, k_w2, k_b2,
     k_x3, k_w3, k_b3) = jax.random.split(key, 10)

    # Case 1: small shapes, f32, resident-weight path (1-D batch grid).
    B, D, C = 8, 32, 16
    samples = jax.random.normal(k_x, (B, D), dtype=jnp.float32)
    targets = jax.random.randint(k_t, (B,), 0, C, dtype=jnp.int32)
    weight = jax.random.normal(k_w, (C, D), dtype=jnp.float32) * 0.02
    bias = jax.random.normal(k_b, (C,), dtype=jnp.float32) * 0.01

    out = linear_postprocessor(samples, targets, weight, bias)
    jax.block_until_ready(out["preds"])
    jax.block_until_ready(out["target"])
    ref = samples @ weight.T + bias
    assert out["preds"].shape == (B, C)
    assert jnp.allclose(out["preds"], ref, atol=1e-5, rtol=1e-5)
    assert jnp.array_equal(out["target"], targets)

    # Case 2: forces the tiled path (class tiling + K-tiling with accumulator).
    B2, D2, C2 = 384, 256, 200
    x2 = jax.random.normal(k_x2, (B2, D2), dtype=jnp.float32)
    w2 = jax.random.normal(k_w2, (C2, D2), dtype=jnp.float32) * 0.02
    b2 = jax.random.normal(k_b2, (C2,), dtype=jnp.float32) * 0.01
    preds2 = linear_classifier(x2, w2, b2, tile_b=128, tile_c=128, tile_d=128)
    jax.block_until_ready(preds2)
    ref2 = x2 @ w2.T + b2
    assert preds2.shape == (B2, C2)
    assert jnp.allclose(preds2, ref2, atol=1e-4, rtol=1e-4)

    # Case 3: bf16 compute path (f32 accumulation, f32 output) on the resident grid.
    B3, D3, C3 = 64, 192, 100
    x3 = jax.random.normal(k_x3, (B3, D3), dtype=jnp.float32)
    w3 = jax.random.normal(k_w3, (C3, D3), dtype=jnp.float32) * 0.02
    b3 = jax.random.normal(k_b3, (C3,), dtype=jnp.float32) * 0.01
    preds3 = linear_classifier(x3, w3, b3, compute_dtype=jnp.bfloat16)
    jax.block_until_ready(preds3)
    ref3 = (x3.astype(jnp.bfloat16).astype(jnp.float32)
            @ w3.astype(jnp.bfloat16).astype(jnp.float32).T + b3)
    assert preds3.shape == (B3, C3)
    assert preds3.dtype == jnp.float32
    assert jnp.allclose(preds3, ref3, atol=2e-3, rtol=2e-3)

    print("KERNEL_OK")
</pallas_src>

<mosaic_0001>
module attributes {stable_mosaic.version = 11 : i64} {
  func.func @_resident_kernel(%arg0: i32, %arg1: memref<8x128xf32, #tpu.memory_space<vmem>>, %arg2: memref<128x128xf32, #tpu.memory_space<vmem>>, %arg3: memref<1x128xf32, #tpu.memory_space<vmem>>, %arg4: memref<8x128xf32, #tpu.memory_space<vmem>>) attributes {dimension_semantics = [#tpu.dimension_semantics<parallel>], iteration_bounds = array<i64: 1>, scalar_prefetch = 0 : i64, scratch_operands = 0 : i64, tpu.core_type = #tpu.core_type<tc>, window_params = [{transform_indices = @transform_0, window_bounds = array<i64: 8, 128>}, {pipeline_mode = #tpu.pipeline_mode<synchronous>, transform_indices = @transform_1, window_bounds = array<i64: 128, 128>}, {pipeline_mode = #tpu.pipeline_mode<synchronous>, transform_indices = @transform_2, window_bounds = array<i64: 1, 128>}, {transform_indices = @transform_3, window_bounds = array<i64: 8, 128>}]} {
    %c0 = arith.constant 0 : index
    %c0_0 = arith.constant 0 : index
    %0 = vector.load %arg1[%c0, %c0_0] : memref<8x128xf32, #tpu.memory_space<vmem>>, vector<8x128xf32>
    %c0_1 = arith.constant 0 : index
    %c0_2 = arith.constant 0 : index
    %1 = vector.load %arg2[%c0_1, %c0_2] : memref<128x128xf32, #tpu.memory_space<vmem>>, vector<128x128xf32>
    %cst = arith.constant dense<0.000000e+00> : vector<8x128xf32>
    %2 = tpu.matmul %0, %1, %cst {dimension_numbers = #tpu.dot_dimension_numbers<[1], [0], [0], [1], [0, 0, 1, 1], [], []>} : vector<8x128xf32>, vector<128x128xf32>, vector<8x128xf32> -> vector<8x128xf32>
    %c0_3 = arith.constant 0 : index
    %c0_4 = arith.constant 0 : index
    %3 = vector.load %arg3[%c0_3, %c0_4] : memref<1x128xf32, #tpu.memory_space<vmem>>, vector<1x128xf32>
    %4 = vector.broadcast %3 : vector<1x128xf32> to vector<8x128xf32>
    %5 = arith.addf %2, %4 : vector<8x128xf32>
    %c0_5 = arith.constant 0 : index
    %c0_6 = arith.constant 0 : index
    %6 = vector.load %arg4[%c0_5, %c0_6] : memref<8x128xf32, #tpu.memory_space<vmem>>, vector<8x128xf32>
    tpu.vector_store %arg4[%c0_5, %c0_6], %5 {strides = array<i32>} : memref<8x128xf32, #tpu.memory_space<vmem>>, vector<8x128xf32>,
    return
  }
  func.func @transform_0(%arg0: i32) -> (i32, i32) {
    %c0_i32 = arith.constant 0 : i32
    %c0_i32_0 = arith.constant 0 : i32
    return %arg0, %c0_i32 : i32, i32
  }
  func.func @transform_1(%arg0: i32) -> (i32, i32) {
    %c0_i32 = arith.constant 0 : i32
    %c0_i32_0 = arith.constant 0 : i32
    %c0_i32_1 = arith.constant 0 : i32
    return %c0_i32, %c0_i32_0 : i32, i32
  }
  func.func @transform_2(%arg0: i32) -> (i32, i32) {
    %c0_i32 = arith.constant 0 : i32
    %c0_i32_0 = arith.constant 0 : i32
    %c0_i32_1 = arith.constant 0 : i32
    return %c0_i32, %c0_i32_0 : i32, i32
  }
  func.func @transform_3(%arg0: i32) -> (i32, i32) {
    %c0_i32 = arith.constant 0 : i32
    %c0_i32_0 = arith.constant 0 : i32
    return %arg0, %c0_i32 : i32, i32
  }
}

</mosaic_0001>

<bundles_post_ra>
// kernel: linear_classifier.1
= control target key start
LH: loop header
LB: loop body
LE: loop exit
PB: predicated region body
PF: predicated region fallthrough
CT: control target
= control target key end

     0   :  { %v202_v1 = vmov 0.0   ;;  %vm203_vm0 = vmmov 0   ;;  %s282_s0 = inlined_call_operand.vmem [shape: f32[8,128], index: 0, kind: input, shape index: {}]   ;;  %s283_s1 = inlined_call_operand.vmem [shape: f32[128,128], index: 1, kind: input, shape index: {}]   ;;  %s284_s2 = inlined_call_operand.vmem [shape: f32[1,128], index: 2, kind: input, shape index: {}]   ;;  %s285_s3 = inlined_call_operand.hbm [shape: f32[8,128], index: 3, kind: output, shape index: {}]  }
   0x1   :  { %v31_v0 = vld [vmem:[%s283_s1 + $0x78] sm:$0xff]  ;;  %142 = vmatprep.subr.mxu0 %v202_v1  ;;  %v30_v2 = vld [vmem:[%s283_s1 + $0x70] sm:$0xff]  ;;  %174 = vmatprep.mubr.msk.f32.mxu0 %vm203_vm0, %v202_v1  ;;  %v29_v3 = vld [vmem:[%s283_s1 + $0x68] sm:$0xff] }
   0x2   :  { %143 = vmatpush3.msra.mxu0 %v31_v0  ;;  %v28_v4 = vld [vmem:[%s283_s1 + $0x60] sm:$0xff] }
   0x3   :  { %144 = vmatprep.subr.mxu0 %v202_v1 }
   0x4   :  { %145 = vmatpush3.msra.mxu0 %v30_v2 }
   0x5   :  { %146 = vmatprep.subr.mxu0 %v202_v1 }
   0x6   :  { %147 = vmatpush3.msra.mxu0 %v29_v3 }
   0x7   :  { %8 = vsyncpa [#allocation3], 0  ;;  %148 = vmatprep.subr.mxu0 %v202_v1  ;;  %v27_v5 = vld [vmem:[%s283_s1 + $0x58] sm:$0xff]  ;;  %v26_v6 = vld [vmem:[%s283_s1 + $0x50] sm:$0xff]  ;;  %s204_s21 = smov [#allocation2]  }
   0x8   :  { %149 = vmatpush3.msra.mxu0 %v28_v4  ;;  %v25_v7 = vld [vmem:[%s283_s1 + $0x48] sm:$0xff]  ;;  %v24_v8 = vld [vmem:[%s283_s1 + $0x40] sm:$0xff]  ;;  %v23_v9 = vld [vmem:[%s283_s1 + $0x38] sm:$0xff]  ;;  %s116_s22 = sshll.u32 %s204_s21, 4  ;;  %s117_s22 = int_to_ptr.vmem [resolvable:$true] %s116_s22 }
   0x9   :  { %150 = vmatprep.subr.mxu0 %v202_v1  ;;  %v22_v10 = vld [vmem:[%s283_s1 + $0x30] sm:$0xff]  ;;  %v21_v11 = vld [vmem:[%s283_s1 + $0x28] sm:$0xff]  ;;  %v20_v12 = vld [vmem:[%s283_s1 + $0x20] sm:$0xff]  ;;  %p185_p1 = scmp.lt.s32.totalorder %s117_s22, %s117_s22 }
   0xa   :  { %151 = vmatpush3.msra.mxu0 %v27_v5  ;;  %v19_v13 = vld [vmem:[%s283_s1 + $0x18] sm:$0xff]  ;;  %v18_v14 = vld [vmem:[%s283_s1 + $0x10] sm:$0xff]  ;;  %v17_v15 = vld [vmem:[%s283_s1 + $0x8] sm:$0xff] }
   0xb   :  { %152 = vmatprep.subr.mxu0 %v202_v1  ;;  %v16_v16 = vld [vmem:[%s283_s1] sm:$0xff]  ;;  %s180_s1 = scalar_lea.vmem %s117_s22, 128 }
   0xc   :  { %153 = vmatpush3.msra.mxu0 %v26_v6  ;;  %v15_v17 = vld [vmem:[%s282_s0] sm:$0xff]  ;;  %p181_p0 = scmp.ne.s32.totalorder %s117_s22, %s180_s1  ;;  %p186_p2 = scmp.lt.s32.totalorder %s180_s1, %s180_s1 }
   0xd   :  { %154 = vmatprep.subr.mxu0 %v202_v1  ;;  %v124_v18 = vld [vmem:[%s284_s2] ss:$0 sm:$0xff] }
   0xe   :  { %155 = vmatpush3.msra.mxu0 %v25_v7  ;;  %p187_p3 = por %p186_p2, %p185_p1 }
   0xf   :  { %156 = vmatprep.subr.mxu0 %v202_v1 }
  0x10   :  { %157 = vmatpush3.msra.mxu0 %v24_v8  ;;  %p188_p4 = pnand %p187_p3, %p181_p0 }
  0x11   :  { %158 = vmatprep.subr.mxu0 %v202_v1 }
  0x12   :  { %159 = vmatpush3.msra.mxu0 %v23_v9 }
  0x13   :  { %160 = vmatprep.subr.mxu0 %v202_v1 }
  0x14   :  { %161 = vmatpush3.msra.mxu0 %v22_v10 }
  0x15   :  { %162 = vmatprep.subr.mxu0 %v202_v1 }
  0x16   :  { %163 = vmatpush3.msra.mxu0 %v21_v11 }
  0x17   :  { %164 = vmatprep.subr.mxu0 %v202_v1 }
  0x18   :  { %165 = vmatpush3.msra.mxu0 %v20_v12 }
  0x19   :  { %166 = vmatprep.subr.mxu0 %v202_v1 }
  0x1a   :  { %167 = vmatpush3.msra.mxu0 %v19_v13 }
  0x1b   :  { %168 = vmatprep.subr.mxu0 %v202_v1 }
  0x1c   :  { %169 = vmatpush3.msra.mxu0 %v18_v14 }
  0x1d   :  { %170 = vmatprep.subr.mxu0 %v202_v1 }
  0x1e   :  { %171 = vmatpush3.msra.mxu0 %v17_v15 }
  0x1f   :  { %172 = vmatprep.subr.mxu0 %v202_v1 }
  0x20   :  { %173 = vmatpush3.msra.mxu0 %v16_v16 }
  0x21   :  { %175 = vmatmul.mubr.f32.vlgmr.msra.gmra.mxu0 %v15_v17 }
  0xe1   :  { %v105_v19 = vpop.f32.mrf.mxu0 }
  0xe2   :  { %v106_v20 = vadd.f32 %v124_v18, %v105_v19 }
  0xe3   :  { %v176_v21 = vpop.f32.mrf.mxu0 }
  0xe4   :  { %109 = vst [vmem:[#allocation2] sm:$0xff] %v106_v20 }
  0xe5   :  { %191 = shalt.err (!%p188_p4)
}
  0xe6   :  { %119 = dma.vmem_to_hbm [thread:$0]  %s117_s22, 128, %s285_s3, [#allocation3]  }
  0xe7   :  { %200 = dma.done.wait [#allocation3], 128  }
  0xe8   :  { %201 = vsyncadd [#allocation3], 4294967168 }
  0xe9   :  { %123 = vsyncpa [#allocation3], 1 }

</bundles_post_ra>
